<compile_context>
chip_gen: v5e
topology: v5e:2x2
jax: 0.10.0
libtpu: 0.0.40
codegen_flags: <defaults>
</compile_context>

<pallas_src>
import functools

import jax
import jax.numpy as jnp
from jax.experimental import pallas as pl
from jax.experimental.pallas import tpu as pltpu

EPS = 1e-6
NEG_SLOPE = 0.01  # torch.nn.LeakyReLU default


def _leaky_relu(x):
    return jnp.where(x > 0, x, NEG_SLOPE * x)


def _affine_coupling_kernel(
    zt_ref,                 # (input_dim, blk)  feature-major input tile (batch on lanes)
    w0t_ref, b0t_ref,       # (2H, half), (2H, 1)        fused first layer (transposed)
    wht_ref, bht_ref,       # (L, 2H, 2H), (L, 2H, 1)    block-diag hidden stack
    wft_ref, bft_ref,       # (2*half, 2H), (2*half, 1)  block-diag final layer
    y_ref, logs_ref,        # (half, blk) [aliased y_r] or (input_dim, blk); (half, blk)
    *, hidden_layers, half, write_full_y,
):
    zt = zt_ref[...]
    z_l = zt[:half, :]                       # (half, blk)
    z_r = zt[half:, :]                       # (half, blk)

    # Fused s/b MLP in feature-major form: h <- W^T @ h + b^T.  Hidden/final
    # weights are block-diagonal so the two paths never mix; rows = [s | b].
    # TODO(synk): for hidden_dim >= ~128 un-fuse the block-diagonal hidden/final
    # matmuls (50% structural-zero MXU waste) and consider bf16 MXU operands.
    h = _leaky_relu(
        jnp.dot(w0t_ref[...], z_l, preferred_element_type=jnp.float32) + b0t_ref[...]
    )
    for i in range(hidden_layers):           # static unroll; L is tiny (default 3)
        h = _leaky_relu(
            jnp.dot(wht_ref[i], h, preferred_element_type=jnp.float32) + bht_ref[i]
        )
    out = jnp.dot(wft_ref[...], h, preferred_element_type=jnp.float32) + bft_ref[...]

    log_s = jnp.clip(out[:half, :], -5.0, 5.0)
    b = out[half:, :]
    y_r = (jnp.exp(log_s) + EPS) * z_r + b

    if write_full_y:
        # No aliasing: write both halves with direct stores (no concat temp).
        y_ref[:half, :] = z_l
        y_ref[half:, :] = y_r
    else:
        # y buffer is aliased with z^T: rows [:half] already hold z_l.
        y_ref[...] = y_r
    logs_ref[...] = log_s


def init_linear_block_params(key, input_dim, hidden_dim, hidden_layers):
    """Deterministic init for LinearBlock: dims [in->h, h->h (x hidden_layers), h->in]."""
    dims = [(input_dim, hidden_dim)]
    for _ in range(hidden_layers):
        dims.append((hidden_dim, hidden_dim))
    dims.append((hidden_dim, input_dim))
    params = []
    for (din, dout) in dims:
        key, kw, kb = jax.random.split(key, 3)
        bound = 1.0 / jnp.sqrt(din)
        w = jax.random.uniform(kw, (din, dout), jnp.float32, -bound, bound)
        bias = jax.random.uniform(kb, (1, dout), jnp.float32, -bound, bound)
        params.append((w, bias))
    return params


def _block_diag(a, b):
    za = jnp.zeros((a.shape[0], b.shape[1]), a.dtype)
    zb = jnp.zeros((b.shape[0], a.shape[1]), b.dtype)
    top = jnp.concatenate([a, za], axis=1)
    bot = jnp.concatenate([zb, b], axis=1)
    return jnp.concatenate([top, bot], axis=0)


def pack_params(s_params, b_params):
    """Pack the two LinearBlocks into one fused / block-diagonal network,
    pre-transposed for the feature-major kernel (weights applied as W^T @ x)."""
    sw0, sb0 = s_params[0]
    bw0, bb0 = b_params[0]
    w0t = jnp.concatenate([sw0.T, bw0.T], axis=0)            # (2H, half)
    b0t = jnp.concatenate([sb0.T, bb0.T], axis=0)            # (2H, 1)

    whts, bhts = [], []
    for (sw, sb), (bw, bb) in zip(s_params[1:-1], b_params[1:-1]):
        whts.append(_block_diag(sw.T, bw.T))                 # (2H, 2H)
        bhts.append(jnp.concatenate([sb.T, bb.T], axis=0))   # (2H, 1)
    wht = jnp.stack(whts)                                    # (L, 2H, 2H)
    bht = jnp.stack(bhts)                                    # (L, 2H, 1)

    swf, sbf = s_params[-1]
    bwf, bbf = b_params[-1]
    wft = _block_diag(swf.T, bwf.T)                          # (2*half, 2H)
    bft = jnp.concatenate([sbf.T, bbf.T], axis=0)            # (2*half, 1)
    return w0t, b0t, wht, bht, wft, bft


def _choose_block(batch, input_dim, hidden_dim, half, *, max_block=8192,
                  act_budget_bytes=8 << 20):
    """Pick the batch (lane-axis) tile from a VMEM activation budget."""
    two_h = 2 * hidden_dim
    per_col = 4 * (2 * input_dim + 4 * half + 6 * max(two_h, input_dim))
    blk = max(128, min(int(act_budget_bytes // per_col), max_block))
    if batch <= 128:
        return batch                                  # one full block (lane rule: full dim)
    blk = (blk // 128) * 128
    # keep >= ~4 grid steps when possible so ("parallel",) feeds both v7x TCs
    blk = min(blk, ((pl.cdiv(batch, 4) + 127) // 128) * 128)
    blk = min(blk, (batch // 128) * 128)              # block must not exceed the array
    return max(blk, 128)


def affine_coupling_forward(z, s_params, b_params, *, max_block_batch=8192):
    """z: (batch, input_dim) float32.  Returns (y, log_s) like the torch module."""
    batch, input_dim = z.shape
    half = input_dim // 2
    assert input_dim == 2 * half, "input_dim must be even"
    hidden_layers = len(s_params) - 2
    assert hidden_layers >= 1, "need at least one hidden layer"
    hidden_dim = s_params[0][0].shape[1]
    two_h = 2 * hidden_dim

    w0t, b0t, wht, bht, wft, bft = pack_params(s_params, b_params)
    weight_bytes = 4 * sum(w.size for w in (w0t, b0t, wht, bht, wft, bft))

    blk = _choose_block(batch, input_dim, hidden_dim, half, max_block=max_block_batch)
    grid = (pl.cdiv(batch, blk),)     # trailing block may be partial -> no jnp.pad copy

    # Feature-major layout: batch on the 128-lane axis -> lane-dense activations
    # and unmasked stores even when input_dim / hidden_dim << 128.
    # TODO(synk): for half/hidden_dim >= 128 a batch-major kernel (no wrapper
    # transposes) avoids the extra transpose traffic; not needed at module sizes.
    zt = z.T                                              # (input_dim, batch)

    # Only store y_r; the left half of the (aliased) y buffer already holds z_l.
    write_full_y = (half % 8 != 0)                        # aliased half-block needs 8-row alignment
    if write_full_y:
        y_spec = pl.BlockSpec((input_dim, blk), lambda i: (0, i))
        io_alias = {}
    else:
        y_spec = pl.BlockSpec((half, blk), lambda i: (1, i))
        io_alias = {0: 0}                                 # donate z^T (wrapper temp) into y^T

    # Resident weights: constant index_map; single-buffer them once they are big
    # (matters for v7x's 64 MiB VMEM / v5e's 16 MiB scoped default).
    single_buf_w = weight_bytes > (4 << 20)

    def _wspec(shape):
        nd = len(shape)
        if single_buf_w:
            return pl.BlockSpec(shape, lambda *_: (0,) * nd, pipeline_mode=pl.Buffered(1))
        return pl.BlockSpec(shape, lambda *_: (0,) * nd)

    # Explicit VMEM budget: weights (+ double buffer) + double-buffered IO + temps.
    io_bytes = 4 * blk * (input_dim + (input_dim if write_full_y else half) + half)
    tmp_bytes = 4 * blk * 4 * max(two_h, input_dim)
    vmem_need = (1 if single_buf_w else 2) * weight_bytes + 2 * io_bytes + tmp_bytes
    vmem_limit = int(min(max(2 * vmem_need, 32 << 20), 64 << 20))

    flops_per_col = 2 * (half * two_h + hidden_layers * two_h * two_h
                         + two_h * 2 * half) + 12 * input_dim
    cost = pl.CostEstimate(
        flops=int(batch * flops_per_col),
        transcendentals=int(batch * half),
        bytes_accessed=int(4 * batch * (input_dim + 2 * half) + weight_bytes),
    )

    kernel = functools.partial(
        _affine_coupling_kernel,
        hidden_layers=hidden_layers, half=half, write_full_y=write_full_y,
    )

    yt, logst = pl.pallas_call(
        kernel,
        out_shape=(
            jax.ShapeDtypeStruct((input_dim, batch), jnp.float32),
            jax.ShapeDtypeStruct((half, batch), jnp.float32),
        ),
        grid_spec=pltpu.PrefetchScalarGridSpec(
            num_scalar_prefetch=0,
            grid=grid,
            in_specs=[
                pl.BlockSpec((input_dim, blk), lambda i: (0, i)),
                _wspec(w0t.shape), _wspec(b0t.shape),
                _wspec(wht.shape), _wspec(bht.shape),
                _wspec(wft.shape), _wspec(bft.shape),
            ],
            out_specs=(
                y_spec,
                pl.BlockSpec((half, blk), lambda i: (0, i)),
            ),
        ),
        compiler_params=pltpu.CompilerParams(
            dimension_semantics=("parallel",),
            vmem_limit_bytes=vmem_limit,
        ),
        cost_estimate=cost,
        input_output_aliases=io_alias,
    )(zt, w0t, b0t, wht, bht, wft, bft)

    # Back to the module's batch-major convention.
    return yt.T, logst.T


def affine_coupling_reference(z, s_params, b_params):
    """Pure-JAX reference matching the torch forward (un-fused params)."""
    half = z.shape[1] // 2
    z_l, z_r = z[:, :half], z[:, half:]

    def mlp(x, params):
        h = x
        for (w, bias) in params[:-1]:
            h = _leaky_relu(h @ w + bias)
        w, bias = params[-1]
        return h @ w + bias

    log_s = jnp.clip(mlp(z_l, s_params), -5.0, 5.0)
    b = mlp(z_l, b_params)
    s = jnp.exp(log_s) + EPS
    y_r = s * z_r + b
    return jnp.concatenate([z_l, y_r], axis=1), log_s


if __name__ == "__main__":
    input_dim = 16      # coupling splits into two halves of 8
    hidden_dim = 8      # module default
    hidden_layers = 3   # module default

    key = jax.random.PRNGKey(0)
    kz, ks, kb, kz2 = jax.random.split(key, 4)

    s_params = init_linear_block_params(ks, input_dim // 2, hidden_dim, hidden_layers)
    b_params = init_linear_block_params(kb, input_dim // 2, hidden_dim, hidden_layers)

    fwd = jax.jit(affine_coupling_forward)

    # Small single-block case (module-default sizes).
    z = jax.random.normal(kz, (8, input_dim), jnp.float32)
    y, log_s = fwd(z, s_params, b_params)
    y = jax.block_until_ready(y)
    log_s = jax.block_until_ready(log_s)
    y_ref, log_s_ref = affine_coupling_reference(z, s_params, b_params)
    assert jnp.allclose(y, y_ref, atol=1e-5, rtol=1e-5)
    assert jnp.allclose(log_s, log_s_ref, atol=1e-5, rtol=1e-5)

    # Multi-block case with a partial trailing tile (exercises the cdiv grid,
    # the aliased half-width y store and masked tail writes).
    z2 = jax.random.normal(kz2, (300, input_dim), jnp.float32)
    y2, log_s2 = fwd(z2, s_params, b_params)
    y2 = jax.block_until_ready(y2)
    log_s2 = jax.block_until_ready(log_s2)
    y2_ref, log_s2_ref = affine_coupling_reference(z2, s_params, b_params)
    assert jnp.allclose(y2, y2_ref, atol=1e-5, rtol=1e-5)
    assert jnp.allclose(log_s2, log_s2_ref, atol=1e-5, rtol=1e-5)

    # log_det_jacobian: simple row reduction, plain JAX glue (sum of clipped
    # log_s, same quantity the torch module sums).
    _ = jax.block_until_ready(jnp.sum(log_s, axis=1))

    print("KERNEL_OK")
</pallas_src>

<mosaic_0001>
module attributes {stable_mosaic.version = 11 : i64} {
  func.func @_affine_coupling_kernel(%arg0: i32, %arg1: memref<16x8xf32, #tpu.memory_space<vmem>>, %arg2: memref<16x8xf32, #tpu.memory_space<vmem>>, %arg3: memref<16x1xf32, #tpu.memory_space<vmem>>, %arg4: memref<3x16x16xf32, #tpu.memory_space<vmem>>, %arg5: memref<3x16x1xf32, #tpu.memory_space<vmem>>, %arg6: memref<16x16xf32, #tpu.memory_space<vmem>>, %arg7: memref<16x1xf32, #tpu.memory_space<vmem>>, %arg8: memref<8x8xf32, #tpu.memory_space<vmem>>, %arg9: memref<8x8xf32, #tpu.memory_space<vmem>>) attributes {dimension_semantics = [#tpu.dimension_semantics<parallel>], iteration_bounds = array<i64: 1>, scalar_prefetch = 0 : i64, scratch_operands = 0 : i64, tpu.core_type = #tpu.core_type<tc>, window_params = [{transform_indices = @transform_0, window_bounds = array<i64: 16, 8>}, {pipeline_mode = #tpu.pipeline_mode<synchronous>, transform_indices = @transform_1, window_bounds = array<i64: 16, 8>}, {pipeline_mode = #tpu.pipeline_mode<synchronous>, transform_indices = @transform_2, window_bounds = array<i64: 16, 1>}, {pipeline_mode = #tpu.pipeline_mode<synchronous>, transform_indices = @transform_3, window_bounds = array<i64: 3, 16, 16>}, {pipeline_mode = #tpu.pipeline_mode<synchronous>, transform_indices = @transform_4, window_bounds = array<i64: 3, 16, 1>}, {pipeline_mode = #tpu.pipeline_mode<synchronous>, transform_indices = @transform_5, window_bounds = array<i64: 16, 16>}, {pipeline_mode = #tpu.pipeline_mode<synchronous>, transform_indices = @transform_6, window_bounds = array<i64: 16, 1>}, {transform_indices = @transform_7, window_bounds = array<i64: 8, 8>}, {transform_indices = @transform_8, window_bounds = array<i64: 8, 8>}]} {
    %c0 = arith.constant 0 : index
    %c0_0 = arith.constant 0 : index
    %0 = vector.load %arg1[%c0, %c0_0] : memref<16x8xf32, #tpu.memory_space<vmem>>, vector<16x8xf32>
    %1 = vector.extract_strided_slice %0 {offsets = [0, 0], sizes = [8, 8], strides = [1, 1]} : vector<16x8xf32> to vector<8x8xf32>
    %2 = vector.extract_strided_slice %0 {offsets = [8, 0], sizes = [8, 8], strides = [1, 1]} : vector<16x8xf32> to vector<8x8xf32>
    %c0_1 = arith.constant 0 : index
    %c0_2 = arith.constant 0 : index
    %3 = vector.load %arg2[%c0_1, %c0_2] : memref<16x8xf32, #tpu.memory_space<vmem>>, vector<16x8xf32>
    %cst = arith.constant dense<0.000000e+00> : vector<16x8xf32>
    %4 = tpu.matmul %3, %1, %cst {dimension_numbers = #tpu.dot_dimension_numbers<[1], [0], [0], [1], [0, 0, 1, 1], [], []>} : vector<16x8xf32>, vector<8x8xf32>, vector<16x8xf32> -> vector<16x8xf32>
    %c0_3 = arith.constant 0 : index
    %c0_4 = arith.constant 0 : index
    %5 = vector.load %arg3[%c0_3, %c0_4] : memref<16x1xf32, #tpu.memory_space<vmem>>, vector<16x1xf32>
    %6 = vector.broadcast %5 : vector<16x1xf32> to vector<16x8xf32>
    %7 = arith.addf %4, %6 : vector<16x8xf32>
    %cst_5 = arith.constant 0.000000e+00 : f32
    %8 = vector.broadcast %cst_5 : f32 to vector<16x8xf32>
    %9 = arith.cmpf ogt, %7, %8 : vector<16x8xf32>
    %cst_6 = arith.constant 0.00999999977 : f32
    %10 = vector.broadcast %cst_6 : f32 to vector<16x8xf32>
    %11 = arith.mulf %10, %7 : vector<16x8xf32>
    %12 = arith.select %9, %7, %11 : vector<16x8xi1>, vector<16x8xf32>
    %c0_7 = arith.constant 0 : index
    %c0_8 = arith.constant 0 : index
    %c0_9 = arith.constant 0 : index
    %13 = vector.load %arg4[%c0_7, %c0_8, %c0_9] : memref<3x16x16xf32, #tpu.memory_space<vmem>>, vector<1x16x16xf32>
    %14 = vector.shape_cast %13 : vector<1x16x16xf32> to vector<16x16xf32>
    %cst_10 = arith.constant dense<0.000000e+00> : vector<16x8xf32>
    %15 = tpu.matmul %14, %12, %cst_10 {dimension_numbers = #tpu.dot_dimension_numbers<[1], [0], [0], [1], [0, 0, 1, 1], [], []>} : vector<16x16xf32>, vector<16x8xf32>, vector<16x8xf32> -> vector<16x8xf32>
    %c0_11 = arith.constant 0 : index
    %c0_12 = arith.constant 0 : index
    %c0_13 = arith.constant 0 : index
    %16 = vector.load %arg5[%c0_11, %c0_12, %c0_13] : memref<3x16x1xf32, #tpu.memory_space<vmem>>, vector<1x16x1xf32>
    %17 = vector.shape_cast %16 : vector<1x16x1xf32> to vector<16x1xf32>
    %18 = vector.broadcast %17 : vector<16x1xf32> to vector<16x8xf32>
    %19 = arith.addf %15, %18 : vector<16x8xf32>
    %cst_14 = arith.constant 0.000000e+00 : f32
    %20 = vector.broadcast %cst_14 : f32 to vector<16x8xf32>
    %21 = arith.cmpf ogt, %19, %20 : vector<16x8xf32>
    %cst_15 = arith.constant 0.00999999977 : f32
    %22 = vector.broadcast %cst_15 : f32 to vector<16x8xf32>
    %23 = arith.mulf %22, %19 : vector<16x8xf32>
    %24 = arith.select %21, %19, %23 : vector<16x8xi1>, vector<16x8xf32>
    %c1 = arith.constant 1 : index
    %c0_16 = arith.constant 0 : index
    %c0_17 = arith.constant 0 : index
    %25 = vector.load %arg4[%c1, %c0_16, %c0_17] : memref<3x16x16xf32, #tpu.memory_space<vmem>>, vector<1x16x16xf32>
    %26 = vector.shape_cast %25 : vector<1x16x16xf32> to vector<16x16xf32>
    %cst_18 = arith.constant dense<0.000000e+00> : vector<16x8xf32>
    %27 = tpu.matmul %26, %24, %cst_18 {dimension_numbers = #tpu.dot_dimension_numbers<[1], [0], [0], [1], [0, 0, 1, 1], [], []>} : vector<16x16xf32>, vector<16x8xf32>, vector<16x8xf32> -> vector<16x8xf32>
    %c1_19 = arith.constant 1 : index
    %c0_20 = arith.constant 0 : index
    %c0_21 = arith.constant 0 : index
    %28 = vector.load %arg5[%c1_19, %c0_20, %c0_21] : memref<3x16x1xf32, #tpu.memory_space<vmem>>, vector<1x16x1xf32>
    %29 = vector.shape_cast %28 : vector<1x16x1xf32> to vector<16x1xf32>
    %30 = vector.broadcast %29 : vector<16x1xf32> to vector<16x8xf32>
    %31 = arith.addf %27, %30 : vector<16x8xf32>
    %cst_22 = arith.constant 0.000000e+00 : f32
    %32 = vector.broadcast %cst_22 : f32 to vector<16x8xf32>
    %33 = arith.cmpf ogt, %31, %32 : vector<16x8xf32>
    %cst_23 = arith.constant 0.00999999977 : f32
    %34 = vector.broadcast %cst_23 : f32 to vector<16x8xf32>
    %35 = arith.mulf %34, %31 : vector<16x8xf32>
    %36 = arith.select %33, %31, %35 : vector<16x8xi1>, vector<16x8xf32>
    %c2 = arith.constant 2 : index
    %c0_24 = arith.constant 0 : index
    %c0_25 = arith.constant 0 : index
    %37 = vector.load %arg4[%c2, %c0_24, %c0_25] : memref<3x16x16xf32, #tpu.memory_space<vmem>>, vector<1x16x16xf32>
    %38 = vector.shape_cast %37 : vector<1x16x16xf32> to vector<16x16xf32>
    %cst_26 = arith.constant dense<0.000000e+00> : vector<16x8xf32>
    %39 = tpu.matmul %38, %36, %cst_26 {dimension_numbers = #tpu.dot_dimension_numbers<[1], [0], [0], [1], [0, 0, 1, 1], [], []>} : vector<16x16xf32>, vector<16x8xf32>, vector<16x8xf32> -> vector<16x8xf32>
    %c2_27 = arith.constant 2 : index
    %c0_28 = arith.constant 0 : index
    %c0_29 = arith.constant 0 : index
    %40 = vector.load %arg5[%c2_27, %c0_28, %c0_29] : memref<3x16x1xf32, #tpu.memory_space<vmem>>, vector<1x16x1xf32>
    %41 = vector.shape_cast %40 : vector<1x16x1xf32> to vector<16x1xf32>
    %42 = vector.broadcast %41 : vector<16x1xf32> to vector<16x8xf32>
    %43 = arith.addf %39, %42 : vector<16x8xf32>
    %cst_30 = arith.constant 0.000000e+00 : f32
    %44 = vector.broadcast %cst_30 : f32 to vector<16x8xf32>
    %45 = arith.cmpf ogt, %43, %44 : vector<16x8xf32>
    %cst_31 = arith.constant 0.00999999977 : f32
    %46 = vector.broadcast %cst_31 : f32 to vector<16x8xf32>
    %47 = arith.mulf %46, %43 : vector<16x8xf32>
    %48 = arith.select %45, %43, %47 : vector<16x8xi1>, vector<16x8xf32>
    %c0_32 = arith.constant 0 : index
    %c0_33 = arith.constant 0 : index
    %49 = vector.load %arg6[%c0_32, %c0_33] : memref<16x16xf32, #tpu.memory_space<vmem>>, vector<16x16xf32>
    %cst_34 = arith.constant dense<0.000000e+00> : vector<16x8xf32>
    %50 = tpu.matmul %49, %48, %cst_34 {dimension_numbers = #tpu.dot_dimension_numbers<[1], [0], [0], [1], [0, 0, 1, 1], [], []>} : vector<16x16xf32>, vector<16x8xf32>, vector<16x8xf32> -> vector<16x8xf32>
    %c0_35 = arith.constant 0 : index
    %c0_36 = arith.constant 0 : index
    %51 = vector.load %arg7[%c0_35, %c0_36] : memref<16x1xf32, #tpu.memory_space<vmem>>, vector<16x1xf32>
    %52 = vector.broadcast %51 : vector<16x1xf32> to vector<16x8xf32>
    %53 = arith.addf %50, %52 : vector<16x8xf32>
    %54 = vector.extract_strided_slice %53 {offsets = [0, 0], sizes = [8, 8], strides = [1, 1]} : vector<16x8xf32> to vector<8x8xf32>
    %cst_37 = arith.constant -5.000000e+00 : f32
    %cst_38 = arith.constant 5.000000e+00 : f32
    %55 = vector.broadcast %cst_37 : f32 to vector<8x8xf32>
    %56 = arith.maximumf %55, %54 : vector<8x8xf32>
    %57 = vector.broadcast %cst_38 : f32 to vector<8x8xf32>
    %58 = arith.minimumf %57, %56 : vector<8x8xf32>
    %59 = vector.extract_strided_slice %53 {offsets = [8, 0], sizes = [8, 8], strides = [1, 1]} : vector<16x8xf32> to vector<8x8xf32>
    %60 = math.exp %58 : vector<8x8xf32>
    %cst_39 = arith.constant 9.99999997E-7 : f32
    %61 = vector.broadcast %cst_39 : f32 to vector<8x8xf32>
    %62 = arith.addf %60, %61 : vector<8x8xf32>
    %63 = arith.mulf %62, %2 : vector<8x8xf32>
    %64 = arith.addf %63, %59 : vector<8x8xf32>
    %c0_40 = arith.constant 0 : index
    %c0_41 = arith.constant 0 : index
    %65 = vector.load %arg8[%c0_40, %c0_41] : memref<8x8xf32, #tpu.memory_space<vmem>>, vector<8x8xf32>
    tpu.vector_store %arg8[%c0_40, %c0_41], %64 {strides = array<i32>} : memref<8x8xf32, #tpu.memory_space<vmem>>, vector<8x8xf32>,
    %c0_42 = arith.constant 0 : index
    %c0_43 = arith.constant 0 : index
    %66 = vector.load %arg9[%c0_42, %c0_43] : memref<8x8xf32, #tpu.memory_space<vmem>>, vector<8x8xf32>
    tpu.vector_store %arg9[%c0_42, %c0_43], %58 {strides = array<i32>} : memref<8x8xf32, #tpu.memory_space<vmem>>, vector<8x8xf32>,
    return
  }
  func.func @transform_0(%arg0: i32) -> (i32, i32) {
    %c0_i32 = arith.constant 0 : i32
    %c0_i32_0 = arith.constant 0 : i32
    return %c0_i32, %arg0 : i32, i32
  }
  func.func @transform_1(%arg0: i32) -> (i32, i32) {
    %c0_i32 = arith.constant 0 : i32
    %c0_i32_0 = arith.constant 0 : i32
    %c0_i32_1 = arith.constant 0 : i32
    return %c0_i32, %c0_i32_0 : i32, i32
  }
  func.func @transform_2(%arg0: i32) -> (i32, i32) {
    %c0_i32 = arith.constant 0 : i32
    %c0_i32_0 = arith.constant 0 : i32
    %c0_i32_1 = arith.constant 0 : i32
    return %c0_i32, %c0_i32_0 : i32, i32
  }
  func.func @transform_3(%arg0: i32) -> (i32, i32, i32) {
    %c0_i32 = arith.constant 0 : i32
    %c0_i32_0 = arith.constant 0 : i32
    %c0_i32_1 = arith.constant 0 : i32
    %c0_i32_2 = arith.constant 0 : i32
    return %c0_i32, %c0_i32_0, %c0_i32_1 : i32, i32, i32
  }
  func.func @transform_4(%arg0: i32) -> (i32, i32, i32) {
    %c0_i32 = arith.constant 0 : i32
    %c0_i32_0 = arith.constant 0 : i32
    %c0_i32_1 = arith.constant 0 : i32
    %c0_i32_2 = arith.constant 0 : i32
    return %c0_i32, %c0_i32_0, %c0_i32_1 : i32, i32, i32
  }
  func.func @transform_5(%arg0: i32) -> (i32, i32) {
    %c0_i32 = arith.constant 0 : i32
    %c0_i32_0 = arith.constant 0 : i32
    %c0_i32_1 = arith.constant 0 : i32
    return %c0_i32, %c0_i32_0 : i32, i32
  }
  func.func @transform_6(%arg0: i32) -> (i32, i32) {
    %c0_i32 = arith.constant 0 : i32
    %c0_i32_0 = arith.constant 0 : i32
    %c0_i32_1 = arith.constant 0 : i32
    return %c0_i32, %c0_i32_0 : i32, i32
  }
  func.func @transform_7(%arg0: i32) -> (i32, i32) {
    %c1_i32 = arith.constant 1 : i32
    %c0_i32 = arith.constant 0 : i32
    return %c1_i32, %arg0 : i32, i32
  }
  func.func @transform_8(%arg0: i32) -> (i32, i32) {
    %c0_i32 = arith.constant 0 : i32
    %c0_i32_0 = arith.constant 0 : i32
    return %c0_i32, %arg0 : i32, i32
  }
}

</mosaic_0001>

<bundles_post_ra>
// kernel: affine_coupling_forward.1
= control target key start
LH: loop header
LB: loop body
LE: loop exit
PB: predicated region body
PF: predicated region fallthrough
CT: control target
= control target key end

     0   :  { %vm46_vm0 = vcmask 64512   ;;  %v323_v0 = vmov 0   ;;  %vm96_vm3 = vcmask 130048   ;;  %s453_s2 = inlined_call_operand.vmem [shape: f32[16,1], index: 2, kind: input, shape index: {}]   ;;  %s454_s0 = inlined_call_operand.vmem [shape: f32[16,8], index: 0, kind: input, shape index: {}, may-alias: {0,7}]   ;;  %s455_s1 = inlined_call_operand.vmem [shape: f32[16,8], index: 1, kind: input, shape index: {}]   ;;  %s456_s4 = inlined_call_operand.vmem [shape: f32[3,16,1], index: 4, kind: input, shape index: {}]   ;;  %s457_s6 = inlined_call_operand.vmem [shape: f32[16,1], index: 6, kind: input, shape index: {}]   ;;  %s458_s3 = inlined_call_operand.vmem [shape: f32[3,16,16], index: 3, kind: input, shape index: {}]   ;;  %s459_s5 = inlined_call_operand.vmem [shape: f32[16,16], index: 5, kind: input, shape index: {}]   ;;  %s460_s8 = inlined_call_operand.vmem [shape: f32[8,8], index: 8, kind: output, shape index: {1}]   ;;  %s461_s7 = inlined_call_operand.vmem [shape: f32[16,8], index: 7, kind: output, shape index: {0}, may-alias: {0,7}]  }
   0x1   :  { %318 = vset.pattern.permute.xlu0 %v323_v0  ;;  %v35_v1 = vld [vmem:[%s453_s2 + $0x8] sm:$0xff]  ;;  %v30_v2 = vld [vmem:[%s454_s0] sm:$0xff]  ;;  %319 = vset.pattern.permute.xlu1 %v323_v0  ;;  %v303_v23 = vld [vmem:[%s456_s4 + $0x18] sm:$0xff] }
   0x2   :  { %43 = vperm.xlu0 %318, %v35_v1   ;;  %68 = vmatpush.msra.mxu0 %v30_v2  ;;  %v32_v3 = vld [vmem:[%s455_s1] sm:$0xff]  ;;  %v33_v4 = vld [vmem:[%s455_s1 + $0x8] sm:$0xff]  ;;  %v302_v25 = vld [vmem:[%s456_s4 + $0x10] sm:$0xff] }
   0x3   :  { %316 = vmatpush.msra.mxu1 %v30_v2  ;;  %296 = vmatmul.msk.f32.vlgmr.msra.gmra.mxu0 %vm46_vm0, %v32_v3  ;;  %v34_v5 = vld [vmem:[%s453_s2] sm:$0xff]  ;;  %v309_v6 = vld [vmem:[%s456_s4 + $0x28] sm:$0xff]  ;;  %v300_v35 = vld [vmem:[%s458_s3 + $0x10] sm:$0xff] }
   0x4   :  { %297 = vmatmul.msk.f32.vlgmr.msra.gmra.mxu1 %vm46_vm0, %v33_v4  ;;  %320 = vset.pattern.permute.xlu2 %v323_v0  ;;  %v237_v7 = vld [vmem:[%s457_s6 + $0x8] sm:$0xff]  ;;  %v84_v9 = vld [vmem:[%s456_s4] sm:$0xff]  ;;  %v301_v37 = vld [vmem:[%s458_s3 + $0x18] sm:$0xff] }
   0x5   :  { %v85_v8 = vld [vmem:[%s456_s4 + $0x8] sm:$0xff]  ;;  %v308_v10 = vld [vmem:[%s456_s4 + $0x20] sm:$0xff]  ;;  %145 = vperm.xlu2 %320, %v303_v23  }
   0x6   :  { %93 = vperm.xlu1 %319, %v85_v8   ;;  %v82_v20 = vld [vmem:[%s458_s3] sm:$0xff]  ;;  %v83_v22 = vld [vmem:[%s458_s3 + $0x8] sm:$0xff] }
   0x7   :  { %v236_v29 = vld [vmem:[%s457_s6] sm:$0xff]  ;;  %v307_v49 = vld [vmem:[%s458_s3 + $0x28] sm:$0xff] }
   0x8   :  { %v306_v47 = vld [vmem:[%s458_s3 + $0x20] sm:$0xff]  ;;  %v235_v61 = vld [vmem:[%s459_s5 + $0x8] sm:$0xff] }
   0x9   :  { %v234_v59 = vld [vmem:[%s459_s5] sm:$0xff]  ;;  %v31_v4 = vld [vmem:[%s454_s0 + $0x8] sm:$0xff] }
   0xa   :  { %38 = vperm.xlu0 %318, %v34_v5  }
   0xd   :  { %140 = vperm.xlu2 %320, %v302_v25  }
   0xe   :  { %88 = vperm.xlu1 %319, %v84_v9  }
  0x12   :  { %196 = vperm.xlu0 %318, %v309_v6  }
  0x15   :  { %240 = vperm.xlu2 %320, %v236_v29  }
  0x16   :  { %191 = vperm.xlu1 %319, %v308_v10  }
  0x1a   :  { %245 = vperm.xlu0 %318, %v237_v7  }
  0x5f   :  { %v146_v38 = vpop.permute.xlu2 %145 }
  0x67   :  { %v141_v40 = vpop.permute.xlu2 %140 }
  0x6f   :  { %v241_v62 = vpop.permute.xlu2 %240 }
  0x74   :  { %v44_v11 = vpop.permute.xlu0 %43 }
  0x78   :  { %v94_v24 = vpop.permute.xlu1 %93 }
  0x7c   :  { %v39_v12 = vpop.permute.xlu0 %38 }
  0x80   :  { %v70_v13 = vpop.f32.mrf.mxu0  ;;  %v89_v27 = vpop.permute.xlu1 %88 }
  0x81   :  { %v71_v14 = vadd.f32 %v70_v13, %v39_v12  ;;  %v73_v15 = vpop.f32.mrf.mxu1 }
  0x82   :  { %v74_v16 = vadd.f32 %v73_v15, %v44_v11 }
  0x83   :  { %v78_v18 = vmul.f32 0.01, %v71_v14  ;;  %vm76_vm2 = vcmp.gt.f32.partialorder %v71_v14, 0.0 }
  0x84   :  { %vm77_vm1 = vcmp.gt.f32.partialorder %v74_v16, 0.0  ;;  %v79_v17 = vmul.f32 0.01, %v74_v16  ;;  %v197_v53 = vpop.permute.xlu0 %196 }
  0x85   :  { %v80_v21 = vsel %vm76_vm2, %v71_v14, %v78_v18 }
  0x86   :  { %v81_v19 = vsel %vm77_vm1, %v74_v16, %v79_v17 }
  0x87   :  { %117 = vmatpush.msrb.mxu1 %v81_v19 }
  0x88   :  { %v192_v51 = vpop.permute.xlu1 %191 }
  0x89   :  { %118 = vmatpush.msrb.mxu1 %v80_v21 }
  0x8a   :  { %298 = vmatmul.msk.f32.vlgmr.msrb.gmra.mxu1 %vm96_vm3, %v82_v20 }
  0x8c   :  { %v246_v7 = vpop.permute.xlu0 %245 }
  0x92   :  { %299 = vmatmul.msk.f32.gmra.mxu1 %vm96_vm3, %v83_v22 }
 0x107   :  { %v120_v26 = vpop.f32.mrf.mxu1 }
 0x108   :  { %v121_v28 = vadd.f32 %v120_v26, %v89_v27 }
 0x10a   :  { %v128_v33 = vmul.f32 0.01, %v121_v28  ;;  %vm126_vm5 = vcmp.gt.f32.partialorder %v121_v28, 0.0 }
 0x10c   :  { %v130_v36 = vsel %vm126_vm5, %v121_v28, %v128_v33 }
 0x10f   :  { %v123_v30 = vpop.f32.mrf.mxu1 }
 0x110   :  { %v124_v31 = vadd.f32 %v123_v30, %v94_v24 }
 0x112   :  { %vm127_vm4 = vcmp.gt.f32.partialorder %v124_v31, 0.0  ;;  %v129_v32 = vmul.f32 0.01, %v124_v31 }
 0x114   :  { %v131_v34 = vsel %vm127_vm4, %v124_v31, %v129_v32 }
 0x115   :  { %168 = vmatpush.msra.mxu2 %v131_v34 }
 0x117   :  { %169 = vmatpush.msra.mxu2 %v130_v36 }
 0x118   :  { %304 = vmatmul.msk.f32.vlgmr.msra.gmra.mxu2 %vm96_vm3, %v300_v35 }
 0x120   :  { %305 = vmatmul.msk.f32.gmra.mxu2 %vm96_vm3, %v301_v37 }
 0x19b   :  { %v171_v39 = vpop.f32.mrf.mxu2 }
 0x19c   :  { %v172_v41 = vadd.f32 %v171_v39, %v141_v40 }
 0x19e   :  { %v179_v45 = vmul.f32 0.01, %v172_v41  ;;  %vm177_vm7 = vcmp.gt.f32.partialorder %v172_v41, 0.0 }
 0x1a0   :  { %v181_v48 = vsel %vm177_vm7, %v172_v41, %v179_v45 }
 0x1a3   :  { %v174_v42 = vpop.f32.mrf.mxu2 }
 0x1a4   :  { %v175_v43 = vadd.f32 %v174_v42, %v146_v38 }
 0x1a6   :  { %vm178_vm6 = vcmp.gt.f32.partialorder %v175_v43, 0.0  ;;  %v180_v44 = vmul.f32 0.01, %v175_v43 }
 0x1a8   :  { %v182_v46 = vsel %vm178_vm6, %v175_v43, %v180_v44 }
 0x1a9   :  { %219 = vmatpush.msra.mxu3 %v182_v46 }
 0x1ab   :  { %220 = vmatpush.msra.mxu3 %v181_v48 }
 0x1ac   :  { %310 = vmatmul.msk.f32.vlgmr.msra.gmra.mxu3 %vm96_vm3, %v306_v47 }
 0x1b4   :  { %311 = vmatmul.msk.f32.gmra.mxu3 %vm96_vm3, %v307_v49 }
 0x22f   :  { %v222_v50 = vpop.f32.mrf.mxu3 }
 0x230   :  { %v223_v52 = vadd.f32 %v222_v50, %v192_v51 }
 0x232   :  { %v230_v57 = vmul.f32 0.01, %v223_v52  ;;  %vm228_vm9 = vcmp.gt.f32.partialorder %v223_v52, 0.0 }
 0x234   :  { %v232_v60 = vsel %vm228_vm9, %v223_v52, %v230_v57 }
 0x237   :  { %v225_v54 = vpop.f32.mrf.mxu3 }
 0x238   :  { %v226_v55 = vadd.f32 %v225_v54, %v197_v53 }
 0x23a   :  { %vm229_vm8 = vcmp.gt.f32.partialorder %v226_v55, 0.0  ;;  %v231_v56 = vmul.f32 0.01, %v226_v55 }
 0x23c   :  { %v233_v58 = vsel %vm229_vm8, %v226_v55, %v231_v56 }
 0x23d   :  { %268 = vmatpush.msrb.mxu0 %v233_v58 }
 0x23f   :  { %269 = vmatpush.msrb.mxu0 %v232_v60 }
 0x240   :  { %312 = vmatmul.msk.f32.vlgmr.msrb.gmra.mxu0 %vm96_vm3, %v234_v59 }
 0x248   :  { %313 = vmatmul.msk.f32.gmra.mxu0 %vm96_vm3, %v235_v61 }
 0x2bd   :  { %v271_v63 = vpop.f32.mrf.mxu0 }
 0x2be   :  { %v272_v0 = vadd.f32 %v271_v63, %v241_v62 }
 0x2c0   :  { %v314_v1 = vclamps-f32 %v272_v0, 5.0 }
 0x2c2   :  { %v279_v2 = vmul.f32 1.442695, %v314_v1  ;;  %285 = vst.msk [vmem:[%s460_s8] sm:$0xff] %vm46_vm0, %v314_v1 }
 0x2c4   :  { %321 = vpow2.f32 %v279_v2 }
 0x2c5   :  { %v274_v5 = vpop.f32.mrf.mxu0 }
 0x2c6   :  { %v275_v8 = vadd.f32 %v274_v5, %v246_v7 }
 0x2ca   :  { %v322_v3 = vpop.eup %321 }
 0x2cb   :  { %v281_v6 = vadd.f32 1e-06, %v322_v3 }
 0x2cd   :  { %v282_v9 = vmul.f32 %v281_v6, %v31_v4 }
 0x2cf   :  { %v283_v10 = vadd.f32 %v282_v9, %v275_v8 }
 0x2d1   :  { %315 = vst.msk [vmem:[%s461_s7 + $0x8] sm:$0xff] %vm46_vm0, %v283_v10 }

</bundles_post_ra>
